<compile_context>
chip_gen: v7x
topology: tpu7x:2x2x1
jax: 0.10.0
libtpu: 0.0.40
codegen_flags: <defaults>
</compile_context>

<pallas_src>
import jax
import jax.numpy as jnp
from jax import lax
from jax.experimental import pallas as pl
from jax.experimental.pallas import tpu as pltpu


def _pick_tile(n, cap):
    """Largest multiple of 8 that is <= min(n, cap); full dim if n < 8."""
    if n < 8:
        return n
    return max(8, min(cap, (n // 8) * 8))


def _make_kernel(n_rows, ti):
    def ns_kernel(a_ref, b_ref, o_ref):
        # a_ref: (ti, P)      gathered target embeddings for this i-tile
        # b_ref: (tj, P)      K-pre-reduced negative embeddings for this j-tile
        # o_ref: (ti, tj, P)  output tile: o[i, j, p] = a[i, p] * b[j, p]
        bv = b_ref[...]  # (tj, P), loaded once per grid step

        # Only the valid rows of a (possibly boundary) i-tile need work; the
        # masked boundary writeback drops everything past n_rows anyway.
        valid = jnp.minimum(ti, n_rows - pl.program_id(0) * ti)

        def body(i, carry):
            # (1, P) row sublane-broadcast against (tj, P); storing per-row
            # into o_ref avoids ever materializing a (ti, tj, P) broadcast
            # temporary in VMEM (vst-slot + VMEM pressure).
            o_ref[i] = a_ref[pl.ds(i, 1), :] * bv
            return carry

        lax.fori_loop(0, valid, body, 0)

    return ns_kernel


def negative_sampling_forward(E, NE, x, sampled, *, ti_cap=128, tj_cap=256):
    N = x.shape[0]
    P = E.shape[1]

    # Glue (stays in XLA): the data-dependent embedding-row gathers and the
    # reduction over K.  Pre-reducing here cuts kernel-side input DMA by K x
    # and the sum fuses into the gather.
    # TODO(synk): move the gather into the kernel via scalar-prefetch +
    #             pl.Element row gather if the vocab tables must stay in HBM.
    a = jnp.take(E, x[:, 0], axis=0).astype(jnp.float32)                    # (N, P)
    b = jnp.sum(jnp.take(NE, sampled, axis=0).astype(jnp.float32), axis=1)  # (N, P)

    # Tiling: P stays whole on the lane axis; 16 MiB f32 output slabs
    # (128 x 256 x 128) in the big-N case, shrunk to multiples of 8 for small
    # or ragged N.  Block shapes never need to divide N (masked boundaries).
    ti = _pick_tile(N, ti_cap)
    tj = _pick_tile(N, tj_cap)
    grid = (pl.cdiv(N, ti), pl.cdiv(N, tj))

    # VMEM budget: double-buffered output slab + tiny input tiles + slack.
    # Floor above the v5e 16 MiB scoped default; cap at 48 MiB so the
    # working set stays well inside v7x's 64 MiB physical VMEM.
    out_tile_bytes = ti * tj * P * 4
    in_tile_bytes = (ti + tj) * P * 4
    vmem_limit_bytes = 2 * (out_tile_bytes + in_tile_bytes) + (8 << 20)
    vmem_limit_bytes = min(max(vmem_limit_bytes, 32 << 20), 48 << 20)

    cost = pl.CostEstimate(
        flops=N * N * P,
        transcendentals=0,
        bytes_accessed=N * N * P * 4 + 2 * N * P * 4,
    )

    out = pl.pallas_call(
        _make_kernel(N, ti),
        out_shape=jax.ShapeDtypeStruct((N, N, P), jnp.float32),
        grid_spec=pltpu.PrefetchScalarGridSpec(
            num_scalar_prefetch=0,
            grid=grid,
            in_specs=[
                pl.BlockSpec((ti, P), lambda i, j: (i, 0)),
                pl.BlockSpec((tj, P), lambda i, j: (j, 0)),
            ],
            out_specs=pl.BlockSpec((ti, tj, P), lambda i, j: (i, j, 0)),
        ),
        compiler_params=pltpu.CompilerParams(
            dimension_semantics=("parallel", "parallel"),
            vmem_limit_bytes=vmem_limit_bytes,
        ),
        cost_estimate=cost,
    )(a, b)
    # TODO(synk): if the downstream consumer tolerates bf16, emit a bf16
    # output (out_shape dtype + astype before the store) for ~2x on this
    # store-bound kernel.
    return out


def reference(E, NE, x, sampled):
    # Literal transcription of the PyTorch forward (same broadcasting).
    out = E[x]                          # (N, 1, P)
    out = out[:, None, :, :]            # unsqueeze(1) -> (N, 1, 1, P)
    vec = NE[sampled]                   # (N, K, P)
    prod = out * vec[None, :, :, :]     # (N, N, K, P)
    return jnp.sum(prod, axis=2)        # (N, N, P)


if __name__ == "__main__":
    vocab_size = 50
    projection = 128        # P (lane-dense)
    K = 5                   # sampled(k) * skip_size + 1, e.g. 2*2 + 1

    key = jax.random.PRNGKey(0)
    k_e, k_ne, k_x, k_s = jax.random.split(key, 4)

    # nn.Embedding default init: N(0, 1)
    E = jax.random.normal(k_e, (vocab_size, projection), dtype=jnp.float32)
    NE = jax.random.normal(k_ne, (vocab_size, projection), dtype=jnp.float32)

    # Case 1: tile-divisible batch.
    N = 16
    x = jax.random.randint(k_x, (N, 1), 0, vocab_size, dtype=jnp.int32)
    sampled = jax.random.randint(k_s, (N, K), 0, vocab_size, dtype=jnp.int32)

    out = negative_sampling_forward(E, NE, x, sampled)
    out = jax.block_until_ready(out)
    ref = reference(E, NE, x, sampled)
    assert out.shape == (N, N, projection), out.shape
    assert jnp.allclose(out, ref, atol=2e-5, rtol=1e-5), "mismatch vs reference (N=16)"

    # Case 2: batch not divisible by the tile (exercises the masked-boundary path).
    N2 = 20
    x2 = jax.random.randint(k_x, (N2, 1), 0, vocab_size, dtype=jnp.int32)
    sampled2 = jax.random.randint(k_s, (N2, K), 0, vocab_size, dtype=jnp.int32)

    out2 = negative_sampling_forward(E, NE, x2, sampled2)
    out2 = jax.block_until_ready(out2)
    ref2 = reference(E, NE, x2, sampled2)
    assert out2.shape == (N2, N2, projection), out2.shape
    assert jnp.allclose(out2, ref2, atol=2e-5, rtol=1e-5), "mismatch vs reference (N=20)"

    print("KERNEL_OK")
</pallas_src>

<mosaic_0001>
module attributes {stable_mosaic.version = 11 : i64} {
  func.func @ns_kernel(%arg0: i32, %arg1: i32, %arg2: memref<16x128xf32, #tpu.memory_space<vmem>>, %arg3: memref<16x128xf32, #tpu.memory_space<vmem>>, %arg4: memref<16x16x128xf32, #tpu.memory_space<vmem>>) attributes {dimension_semantics = [#tpu.dimension_semantics<parallel>, #tpu.dimension_semantics<parallel>], iteration_bounds = array<i64: 1, 1>, scalar_prefetch = 0 : i64, scratch_operands = 0 : i64, tpu.core_type = #tpu.core_type<tc>, window_params = [{transform_indices = @transform_0, window_bounds = array<i64: 16, 128>}, {transform_indices = @transform_1, window_bounds = array<i64: 16, 128>}, {transform_indices = @transform_2, window_bounds = array<i64: 16, 16, 128>}]} {
    %c0 = arith.constant 0 : index
    %c0_0 = arith.constant 0 : index
    %0 = vector.load %arg3[%c0, %c0_0] : memref<16x128xf32, #tpu.memory_space<vmem>>, vector<16x128xf32>
    %c16_i32 = arith.constant 16 : i32
    %1 = arith.muli %arg0, %c16_i32 : i32
    %c16_i32_1 = arith.constant 16 : i32
    %2 = arith.subi %c16_i32_1, %1 : i32
    %c16_i32_2 = arith.constant 16 : i32
    %3 = arith.minsi %c16_i32_2, %2 : i32
    %c0_i32 = arith.constant 0 : i32
    %c0_i32_3 = arith.constant 0 : i32
    %4 = arith.subi %3, %c0_i32_3 : i32
    %5 = arith.addi %c0_i32_3, %4 : i32
    %c1_i32 = arith.constant 1 : i32
    scf.for %arg5 = %c0_i32_3 to %5 step %c1_i32  : i32 {
      %6 = arith.index_cast %arg5 : i32 to index
      %c0_4 = arith.constant 0 : index
      %7 = vector.load %arg2[%6, %c0_4] : memref<16x128xf32, #tpu.memory_space<vmem>>, vector<1x128xf32>
      %8 = vector.broadcast %7 : vector<1x128xf32> to vector<16x128xf32>
      %9 = arith.mulf %8, %0 : vector<16x128xf32>
      %10 = arith.index_cast %arg5 : i32 to index
      %c0_5 = arith.constant 0 : index
      %c0_6 = arith.constant 0 : index
      %11 = vector.load %arg4[%10, %c0_5, %c0_6] : memref<16x16x128xf32, #tpu.memory_space<vmem>>, vector<1x16x128xf32>
      %12 = vector.shape_cast %11 : vector<1x16x128xf32> to vector<16x128xf32>
      %13 = vector.shape_cast %9 : vector<16x128xf32> to vector<1x16x128xf32>
      tpu.vector_store %arg4[%10, %c0_5, %c0_6], %13 {strides = array<i32>} : memref<16x16x128xf32, #tpu.memory_space<vmem>>, vector<1x16x128xf32>,
    }
    return
  }
  func.func @transform_0(%arg0: i32, %arg1: i32) -> (i32, i32) {
    %c0_i32 = arith.constant 0 : i32
    %c0_i32_0 = arith.constant 0 : i32
    return %arg0, %c0_i32 : i32, i32
  }
  func.func @transform_1(%arg0: i32, %arg1: i32) -> (i32, i32) {
    %c0_i32 = arith.constant 0 : i32
    %c0_i32_0 = arith.constant 0 : i32
    return %arg1, %c0_i32 : i32, i32
  }
  func.func @transform_2(%arg0: i32, %arg1: i32) -> (i32, i32, i32) {
    %c0_i32 = arith.constant 0 : i32
    %c0_i32_0 = arith.constant 0 : i32
    return %arg0, %arg1, %c0_i32 : i32, i32, i32
  }
}

</mosaic_0001>

<bundles_post_ra>
// kernel: tpu_custom_call.1
= control target key start
LH: loop header
LB: loop body
LE: loop exit
PB: predicated region body
PF: predicated region fallthrough
CT: control target
= control target key end

     0   :  { %7 = vsyncpa [#allocation3], 0  ;;  %s250_s0 = inlined_call_operand.hbm [shape: f32[16,128], index: 0, kind: input, shape index: {}]   ;;  %s251_s1 = inlined_call_operand.hbm [shape: f32[16,128], index: 1, kind: input, shape index: {}]   ;;  %s252_s2 = inlined_call_operand.hbm [shape: f32[16,16,128], index: 2, kind: output, shape index: {}]  }
   0x1   :  { %8 = vsyncpa [#allocation6], 0 }
   0x2   :  { %9 = vsyncpa [#allocation4], 0  ;;  %s185_s9 = smov [#allocation2]   ;;  %s105_s13 = scalar_lea.hbm %s250_s0, 256 }
   0x3   :  { %s15_s10 = sshll.u32 %s185_s9, 4  ;;  %p106_p0 = scmp.ne.s32.totalorder %s250_s0, %s105_s13  ;;  %s16_s10 = int_to_ptr.vmem [resolvable:$true] %s15_s10 }
   0x4   :  { %p109_p1 = scmp.lt.u32.totalorder %s105_s13, %s250_s0 }
   0x6   :  { %p111_p2 = pnand %p109_p1, %p106_p0 }
   0x8   :  { %114 = shalt.err (!%p111_p2)
}
   0x9   :  { %s115_s18 = scalar_lea.vmem %s16_s10, 256  ;;  %p120_p4 = scmp.lt.s32.totalorder %s16_s10, %s16_s10 }
   0xa   :  { %p116_p3 = scmp.ne.s32.totalorder %s16_s10, %s115_s18  ;;  %p121_p5 = scmp.lt.s32.totalorder %s115_s18, %s115_s18 }
   0xc   :  { %p122_p6 = por %p121_p5, %p120_p4 }
   0xe   :  { %p123_p7 = pnand %p122_p6, %p116_p3 }
  0x10   :  { %126 = shalt.err (!%p123_p7)
}
  0x11   :  { %s186_s19 = smov 128   ;;  %s187_s20 = smov 8  }
  0x12   :  { %21 = dma.hbm_to_vmem [thread:$0]  %s250_s0, 256, %s16_s10, [#allocation3], %s186_s19, %s186_s19, %s187_s20  }
  0x13   :  { %s188_s23 = smov [#allocation5]   ;;  %s127_s27 = scalar_lea.hbm %s251_s1, 256 }
  0x14   :  { %s27_s24 = sshll.u32 %s188_s23, 4  ;;  %p128_p8 = scmp.ne.s32.totalorder %s251_s1, %s127_s27  ;;  %s28_s24 = int_to_ptr.vmem [resolvable:$true] %s27_s24 }
  0x15   :  { %p131_p9 = scmp.lt.u32.totalorder %s127_s27, %s251_s1 }
  0x17   :  { %p133_p10 = pnand %p131_p9, %p128_p8 }
  0x19   :  { %136 = shalt.err (!%p133_p10)
}
  0x1a   :  { %s137_s4 = scalar_lea.vmem %s28_s24, 256  ;;  %p142_p12 = scmp.lt.s32.totalorder %s28_s24, %s28_s24 }
  0x1b   :  { %p138_p11 = scmp.ne.s32.totalorder %s28_s24, %s137_s4  ;;  %p143_p13 = scmp.lt.s32.totalorder %s137_s4, %s137_s4 }
  0x1d   :  { %p144_p0 = por %p143_p13, %p142_p12 }
  0x1f   :  { %p145_p1 = pnand %p144_p0, %p138_p11 }
  0x21   :  { %148 = shalt.err (!%p145_p1)
}
  0x22   :  { %33 = dma.hbm_to_vmem [thread:$0]  %s251_s1, 256, %s28_s24, [#allocation6], %s186_s19, %s186_s19, %s187_s20  }
  0x23   :  { %175 = dma.done.wait [#allocation3], 256  }
  0x24   :  { %176 = vsyncadd [#allocation3], 4294967040 }
  0x25   :  { %177 = dma.done.wait [#allocation6], 256  }
  0x26   :  { %178 = vsyncadd [#allocation6], 4294967040  ;;  %v40_v0 = vld [vmem:[#allocation5] sm:$0xff]  ;;  %v41_v1 = vld [vmem:[#allocation5 + $0x8] sm:$0xff]  ;;  %s181_s6 = smov 0  }
  0x27 LB: > { %s91_s7 = sshll.u32 %s183_s6, 4  ;;  %s52_s8 = scalar_lea.vmem [#allocation2], %s183_s6  ;;  %s183_s6 = sphi %s181_s6, %s49_s6  }
  0x28   : > { %v90_v2 = vld [vmem:[%s52_s8] ss:$0 sm:$0xff]  ;;  %s61_s9 = scalar_lea.vmem [#allocation7], %s91_s7  ;;  %s49_s6 = sadd.s32 1, %s183_s6  }
  0x29   : > { %v58_v3 = vmul.f32 %v90_v2, %v40_v0  ;;  %v59_v4 = vmul.f32 %v90_v2, %v41_v1  ;;  %p48_p2 = scmp.ge.s32.totalorder %s49_s6, 16 }
  0x2a   :  { %s189_s1 = smov (%p48_p2), [#allocation7]  }
  0x2b   : > { %62 = vst [vmem:[%s61_s9] sm:$0xff] %v58_v3  ;;  %63 = vst [vmem:[%s61_s9 + $0x8] sm:$0xff] %v59_v4  ;;  %51 = sbr.rel (!%p48_p2) target bundleno = 39 (0x27), region = 45  ;;  %s69_s10 = sshll.u32 (%p48_p2), %s189_s1, 4  ;;  %s70_s10 = int_to_ptr.vmem [resolvable:$true] %s69_s10 }
  0x2c   :  { %s149_s11 = scalar_lea.vmem (%p48_p2), %s70_s10, 4096  ;;  %p154_p4 = scmp.lt.s32.totalorder (%p48_p2), %s70_s10, %s70_s10 }
  0x2d   :  { %p150_p3 = scmp.ne.s32.totalorder (%p48_p2), %s70_s10, %s149_s11  ;;  %p155_p5 = scmp.lt.s32.totalorder (%p48_p2), %s149_s11, %s149_s11 }
  0x2f   :  { %p156_p6 = por (%p48_p2), %p155_p5, %p154_p4 }
  0x31   :  { %p157_p7 = pnand (%p48_p2), %p156_p6, %p150_p3 }
  0x33   :  { %160 = shalt.err (!%p157_p7)
}
  0x34   :  { %s161_s14 = scalar_lea.hbm %s252_s2, 4096 }
  0x35   :  { %p162_p8 = scmp.ne.s32.totalorder %s252_s2, %s161_s14  ;;  %p165_p9 = scmp.lt.u32.totalorder %s161_s14, %s252_s2 }
  0x37   :  { %p167_p10 = pnand %p165_p9, %p162_p8 }
  0x39   :  { %170 = shalt.err (!%p167_p10)
}
  0x3a   :  { %75 = dma.vmem_to_hbm [thread:$0]  %s70_s10, 4096, %s252_s2, [#allocation4], %s186_s19, %s186_s19, %s187_s20  }
  0x3b   :  { %179 = dma.done.wait [#allocation4], 4096  }
  0x3c   :  { %180 = vsyncadd [#allocation4], 4294963200 }
  0x3d   :  { %79 = vsyncpa [#allocation3], 1 }
  0x3e   :  { %80 = vsyncpa [#allocation6], 1 }
  0x3f   :  { %81 = vsyncpa [#allocation4], 1 }

</bundles_post_ra>
